<compile_context>
chip_gen: v7x
topology: tpu7x:2x2x1
jax: 0.10.0
libtpu: 0.0.40
codegen_flags: <defaults>
</compile_context>

<pallas_src>
import math
import numpy as np
import jax
import jax.numpy as jnp
from jax.experimental import pallas as pl
from jax.experimental.pallas import tpu as pltpu

LANES = 128     # spatial (H*W) axis zero-padded to one full lane group
NOFF = 7        # depth offsets -3..3 (max depthwise-3D kernel size of the two units)


# ----------------------------- bsm mask (verbatim port) ----------------------
def bsm(n, d):
    a = [[0] * n for _ in range(n)]
    p = 0
    q = n - 1
    w = int((n + 1) / 2)
    t = 0
    while p < d:
        for i in range(p, q):
            a[p][i] = t
        for i in range(p, q):
            a[i][q] = t
        for i in range(q, p, -1):
            a[q][i] = t
        for i in range(q, p, -1):
            a[i][p] = t
        p += 1
        q -= 1
    while p == d or (p > d and p < q):
        for i in range(p, q):
            a[p][i] = 1
        for i in range(p, q):
            a[i][q] = 1
        for i in range(q, p, -1):
            a[q][i] = 1
        for i in range(q, p, -1):
            a[i][p] = 1
        a[w - 1][w - 1] = 1
        p += 1
        q -= 1
    return np.array(a)


# ----------------------------- init-time helpers (numpy) ---------------------
def _ksize21(C):
    gamma, b = 2, 3
    k = int(abs((math.log(C, 2) + b) / gamma))
    return k if k % 2 else k + 1


def _shift_matrix(dh, dw, H, W):
    """S s.t. (x_flat @ S)[h*W+w] = x_flat[(h+dh)*W + (w+dw)] (0 if out of range)."""
    HW = H * W
    S = np.zeros((HW, HW), np.float64)
    for h in range(H):
        hs = h + dh
        if hs < 0 or hs >= H:
            continue
        for w in range(W):
            ws = w + dw
            if ws < 0 or ws >= W:
                continue
            S[hs * W + ws, h * W + w] = 1.0
    return S


def _toeplitz_ncam(w2k, C):
    """A s.t. conv_out[b, r] = sum_q A[r, q] * gap[b, q] for the PyTorch
       Conv2d(1,1,(2,k)) correlation on [gap ; channel-reversed gap]."""
    w2k = np.asarray(w2k, np.float64)
    k = w2k.shape[1]
    p = (k - 1) // 2
    A = np.zeros((C, C))
    for r in range(C):
        for j in range(k):
            q = r + j - p
            if 0 <= q < C:
                A[r, q] += w2k[0, j]
                A[r, C - 1 - q] += w2k[1, j]
    return A


def _init_ncam_fused(key, C, B):
    """Block-diag fused NCAM channel convs: block 0 = plain GAP path (conv1d),
       block 1 = masked GAP path (conv1d1).  Returns (matrix (2CB,2CB), bias (2CB,))."""
    k = _ksize21(C)
    k1, k2, k3, k4 = jax.random.split(key, 4)
    wp = 0.3 * np.asarray(jax.random.normal(k1, (2, k)), np.float64)
    bp = float(0.05 * jax.random.normal(k2, ()))
    wm = 0.3 * np.asarray(jax.random.normal(k3, (2, k)), np.float64)
    bm = float(0.05 * jax.random.normal(k4, ()))
    R = C * B
    M = np.zeros((2 * R, 2 * R), np.float64)
    M[:R, :R] = np.kron(_toeplitz_ncam(wp, C), np.eye(B))
    M[R:, R:] = np.kron(_toeplitz_ncam(wm, C), np.eye(B))
    bias = np.concatenate([np.full(R, bp), np.full(R, bm)])
    return M, bias


def _init_unit(key, IC, c, B, H, W):
    HW = H * W
    C3 = 3 * IC
    R8, R24 = IC * B, C3 * B
    p = (c - 1) // 2
    keys = iter(jax.random.split(key, 32))
    nk = lambda: next(keys)
    gn = lambda shape, s=0.2: s * np.asarray(jax.random.normal(nk(), shape), np.float64)

    # ---- LE_DSC3D: three depthwise 3-D convs with scalar taps, folded per depth offset
    w1 = gn((c, c))                       # kernel (c,1,c): (depth, width)
    w2 = gn((c, c))                       # kernel (c,c,1): (depth, height)
    w3 = gn((c, c))                       # kernel (1,c,c): (height, width)
    b3d = float(gn((), 0.05)) + float(gn((), 0.05)) + float(gn((), 0.05))
    Kc = np.zeros((c, HW, HW), np.float64)
    for i in range(c):
        for j in range(c):
            Kc[i] += w1[i, j] * _shift_matrix(0, j - p, H, W)
            Kc[i] += w2[i, j] * _shift_matrix(j - p, 0, H, W)
    for m in range(c):
        for j in range(c):
            Kc[p] += w3[m, j] * _shift_matrix(m - p, j - p, H, W)
    # K-stack + lane-pad: block g corresponds to depth offset dd = g - NOFF//2
    kc_pad = np.zeros((NOFF * LANES, LANES), np.float64)
    for g in range(NOFF):
        dd = g - NOFF // 2
        i = dd + p
        if 0 <= i < c:
            kc_pad[g * LANES:g * LANES + HW, :HW] = Kc[i]

    # ---- NCAM attention stages (block-diag fused plain+masked channel convs)
    m3a, b3a = _init_ncam_fused(nk(), IC, B)    # NCAM3D at1 (small, IC channels)
    m3b, b3b = _init_ncam_fused(nk(), C3, B)    # NCAM3D at2 (big, 3*IC channels)
    m2a, b2a = _init_ncam_fused(nk(), C3, B)    # NCAM2D at1 (big)
    m2b, b2b = _init_ncam_fused(nk(), IC, B)    # NCAM2D at2 (small)

    # ---- pointwise Conv3d(1,3,1) + BatchNorm3d(3) (eval-mode folding)
    pw3_w, pw3_b = gn((3,)), gn((3,), 0.05)
    g3, be3 = 1.0 + gn((3,), 0.1), gn((3,), 0.1)
    rm3, rv3 = gn((3,), 0.1), 1.0 + np.abs(gn((3,), 0.1))
    s3 = g3 / np.sqrt(rv3 + 1e-5)

    # ---- LE_DSC2D depthwise (c,1) + (1,c) -> fused per-channel weight * boundary mask
    wh, bh = gn((C3, c)), gn((C3,), 0.05)
    ww, bw = gn((C3, c)), gn((C3,), 0.05)
    hh = np.arange(HW) // W
    wwi = np.arange(HW) % W
    wm = np.zeros((2 * c, R24, LANES), np.float64)
    for m in range(c):
        mh = np.zeros(LANES)
        mh[:HW] = ((hh + (m - p) >= 0) & (hh + (m - p) < H)).astype(np.float64)
        wm[m] = np.outer(np.repeat(wh[:, m], B), mh)
    for j in range(c):
        mw = np.zeros(LANES)
        mw[:HW] = ((wwi + (j - p) >= 0) & (wwi + (j - p) < W)).astype(np.float64)
        wm[c + j] = np.outer(np.repeat(ww[:, j], B), mw)

    # ---- pointwise Conv2d(3*IC, IC, 1) + BatchNorm2d(IC) (eval-mode folding)
    pw2_w, pw2_b = gn((IC, C3)), gn((IC,), 0.05)
    g2, be2 = 1.0 + gn((IC,), 0.1), gn((IC,), 0.1)
    rm2, rv2 = gn((IC,), 0.1), 1.0 + np.abs(gn((IC,), 0.1))
    s2 = g2 / np.sqrt(rv2 + 1e-5)

    # ---- pack all per-row scale/shift/bias columns into one lane-dense array
    cols = np.zeros((2 * R24, LANES), np.float64)
    cols[:2 * R24, 0] = b3b                                    # NCAM3D-at2 bias col
    cols[:2 * R24, 1] = b2a                                    # NCAM2D-at1 bias col
    cols[:2 * R8, 2] = b3a                                     # NCAM3D-at1 bias col
    cols[:2 * R8, 3] = b2b                                     # NCAM2D-at2 bias col
    cols[:R24, 4] = np.repeat(s3, IC * B)                      # BN3d scale
    cols[R24:2 * R24, 4] = np.repeat(be3 - rm3 * s3, IC * B)   # BN3d shift
    cols[:R24, 5] = np.repeat(pw3_w, IC * B)                   # pointwise-3D scale
    cols[R24:2 * R24, 5] = np.repeat(pw3_b, IC * B)            # pointwise-3D bias
    cols[:R24, 6] = np.repeat(bh + bw, B)                      # depthwise-2D bias
    cols[:R8, 7] = b3d                                         # depthwise-3D bias
    cols[R8:2 * R8, 7] = np.repeat(pw2_b, B)                   # pointwise-2D bias
    cols[2 * R8:3 * R8, 7] = np.repeat(s2, B)                  # BN2d scale
    cols[3 * R8:4 * R8, 7] = np.repeat(be2 - rm2 * s2, B)      # BN2d shift

    bf16 = lambda a: jnp.asarray(a, jnp.bfloat16)
    f32 = lambda a: jnp.asarray(a, jnp.float32)
    return {
        'kc': bf16(kc_pad),                        # (NOFF*128, 128)
        'nsd': bf16(np.stack([m3a, m2b])),         # (2, 2*R8, 2*R8)
        'nbd': bf16(np.stack([m3b, m2a])),         # (2, 2*R24, 2*R24)
        'wm': f32(wm),                             # (2c, R24, 128)
        'wbig': bf16(np.kron(pw2_w, np.eye(B))),   # (R8, R24)
        'cols': f32(cols),                         # (2*R24, 128)
    }


def init_params(key, IC, ncls, B, H, W):
    """Builds kernel-ready (pre-folded) parameters for the fused forward pass."""
    k1, k2, k3, k4 = jax.random.split(key, 4)
    u1 = _init_unit(k1, IC, 3, B, H, W)
    u2 = _init_unit(k2, IC, 7, B, H, W)
    fc_w = 0.2 * np.asarray(jax.random.normal(k3, (ncls, IC)), np.float64)
    fc_b = 0.05 * np.asarray(jax.random.normal(k4, (ncls,)), np.float64)
    HW = H * W
    mask = np.asarray(bsm(W, (W - 1) // 2 - 1), np.float64).reshape(HW)
    gvec = np.zeros((2, LANES))
    gvec[0, :HW] = 1.0 / HW            # plain GAP weights (valid lanes only)
    gvec[1, :HW] = mask / HW           # masked GAP weights (ScaleMaskModule)
    return {
        'unit1': u1, 'unit2': u2,
        'fc_big': jnp.asarray(np.kron(fc_w, np.eye(B)), jnp.bfloat16),      # (ncls*B, IC*B)
        'fc_b_col': jnp.asarray(np.repeat(fc_b, B).reshape(-1, 1), jnp.float32),
        'gvec': jnp.asarray(gvec, jnp.float32),                              # (2, 128)
    }


# ----------------------------- pltpu.roll direction probe --------------------
_ROLL_LIKE_JNP = None


def _roll_like_jnp():
    """Memoized probe: True if pltpu.roll follows jnp.roll semantics."""
    global _ROLL_LIKE_JNP
    if _ROLL_LIKE_JNP is None:
        def k(x_ref, o_ref):
            o_ref[...] = pltpu.roll(x_ref[...], 1, 1)
        x = jnp.arange(8 * LANES, dtype=jnp.float32).reshape(8, LANES)
        vm = pl.BlockSpec(memory_space=pltpu.MemorySpace.VMEM)
        out = pl.pallas_call(
            k, out_shape=jax.ShapeDtypeStruct((8, LANES), jnp.float32),
            in_specs=[vm], out_specs=vm)(x)
        _ROLL_LIKE_JNP = bool(jnp.allclose(out, jnp.roll(x, 1, axis=1)))
    return _ROLL_LIKE_JNP


# ----------------------------- fused forward ---------------------------------
def _hswish(v):
    return v * jnp.minimum(jnp.maximum(v + 3.0, 0.0), 6.0) * (1.0 / 6.0)


def lite_hcnet_forward(x, params):
    B, IC, H, W = x.shape
    HW = H * W
    R8 = IC * B
    R24 = 3 * IC * B
    ncls_B = params['fc_b_col'].shape[0]
    roll_like_jnp = _roll_like_jnp()

    # channel-major rows (row = channel*B + batch); lane axis = H*W padded to 128
    x2 = jnp.transpose(x, (1, 0, 2, 3)).reshape(R8, HW)
    x2p = jnp.pad(x2, ((0, 0), (0, LANES - HW))).astype(jnp.float32)
    # depth-shifted copies of the input, lane-stacked (K-stacked depthwise-3D operand)
    blocks = []
    for g in range(NOFF):
        dd = g - NOFF // 2
        k = dd * B
        if k == 0:
            blk = x2p
        elif abs(k) >= R8:
            blk = jnp.zeros_like(x2p)
        elif k > 0:
            blk = jnp.pad(x2p[k:, :], ((0, k), (0, 0)))
        else:
            blk = jnp.pad(x2p[:R8 + k, :], ((-k, 0), (0, 0)))
        blocks.append(blk)
    xs = jnp.concatenate(blocks, axis=1).astype(jnp.bfloat16)    # (R8, NOFF*128)

    u1, u2 = params['unit1'], params['unit2']

    def kernel(x_ref, xs_ref, g_ref,
               kc1, nsd1, nbd1, wm1, wb1, co1,
               kc2, nsd2, nbd2, wm2, wb2, co2,
               fcw_ref, fcb_ref, out_ref):
        xin = x_ref[...]                     # (R8, 128) f32
        xsv = xs_ref[...]                    # (R8, NOFF*128) bf16
        grow = g_ref[0:1, :]                 # plain-GAP lane weights (1/HW on valid lanes)
        mrow = g_ref[1:2, :]                 # masked-GAP lane weights

        def lshift(v, d):
            # returns v'[..., n] = v[..., n + d] (wrapped lanes are masked by caller)
            if d == 0:
                return v
            amt = (-d) % LANES if roll_like_jnp else d % LANES
            return pltpu.roll(v, amt, 1)

        def ncam(act, mat, bias_col, r):
            # plain + masked GAP -> fused block-diag channel convs -> gated sigmoid attn
            gap = jnp.sum(act * grow, axis=1, keepdims=True)       # (r,1)
            gapm = jnp.sum(act * mrow, axis=1, keepdims=True)      # (r,1)
            g2 = jnp.concatenate([gap, gapm], axis=0).astype(jnp.bfloat16)
            cv = jnp.dot(mat, g2, preferred_element_type=jnp.float32) + bias_col
            sg = jax.nn.sigmoid(cv)
            at = jax.nn.sigmoid((sg[:r] * sg[r:] - 0.2) * 2.0)
            return act * at

        def le_hcl(c, kc_ref, nsd_ref, nbd_ref, wm_ref, wb_ref, co_ref):
            p = (c - 1) // 2
            cols = co_ref[...]                                     # (2*R24, 128)

            # ---- LE_DSC3D: single K-stacked MXU matmul over (depth offset, spatial)
            s = jnp.dot(xsv, kc_ref[...], preferred_element_type=jnp.float32)   # (R8,128)
            s = s + cols[0:R8, 7:8]                                # summed 3-D conv bias
            s = ncam(s, nsd_ref[0], cols[0:2 * R8, 2:3], R8)       # NCAM3D at1
            # pointwise Conv3d(1,3,1): replicate rows (interleave folded in row order)
            t = jnp.concatenate([s, s, s], axis=0)                 # (R24, 128)
            t = t * cols[0:R24, 5:6] + cols[R24:2 * R24, 5:6]
            t = ncam(t, nbd_ref[0], cols[0:2 * R24, 0:1], R24)     # NCAM3D at2
            # BatchNorm3d(3) (eval-mode folded) + hswish
            t = _hswish(t * cols[0:R24, 4:5] + cols[R24:2 * R24, 4:5])

            # ---- LE_DSC2D: (c,1)+(1,c) depthwise via lane rolls * weight*mask planes
            d = t * (wm_ref[p] + wm_ref[c + p])                    # un-shifted terms
            for m in range(c):
                dh = m - p
                if dh == 0:
                    continue
                d = d + lshift(t, dh * W) * wm_ref[m]
            for j in range(c):
                dw = j - p
                if dw == 0:
                    continue
                d = d + lshift(t, dw) * wm_ref[c + j]
            d = d + cols[0:R24, 6:7]                               # summed dw bias
            d = ncam(d, nbd_ref[1], cols[0:2 * R24, 1:2], R24)     # NCAM2D at1
            # pointwise Conv2d(3*IC, IC, 1) as one channel-mixing matmul
            e = jnp.dot(wb_ref[...], d.astype(jnp.bfloat16),
                        preferred_element_type=jnp.float32) + cols[R8:2 * R8, 7:8]
            e = ncam(e, nsd_ref[1], cols[0:2 * R8, 3:4], R8)       # NCAM2D at2
            # BatchNorm2d (eval-mode folded) + hswish + residual
            return _hswish(e * cols[2 * R8:3 * R8, 7:8]
                           + cols[3 * R8:4 * R8, 7:8]) + xin

        o1 = le_hcl(3, kc1, nsd1, nbd1, wm1, wb1, co1)
        o2 = le_hcl(7, kc2, nsd2, nbd2, wm2, wb2, co2)
        # head: (out1 + out2) -> global average pool (valid lanes only) -> FC
        gap = jnp.sum((o1 + o2) * grow, axis=1, keepdims=True)     # (R8, 1)
        out_ref[...] = jnp.dot(fcw_ref[...], gap.astype(jnp.bfloat16),
                               preferred_element_type=jnp.float32) + fcb_ref[...]

    vm = pl.BlockSpec(memory_space=pltpu.MemorySpace.VMEM)
    out_col = pl.pallas_call(
        kernel,
        out_shape=jax.ShapeDtypeStruct((ncls_B, 1), jnp.float32),
        in_specs=[vm] * 17,
        out_specs=vm,
    )(x2p, xs, params['gvec'],
      u1['kc'], u1['nsd'], u1['nbd'], u1['wm'], u1['wbig'], u1['cols'],
      u2['kc'], u2['nsd'], u2['nbd'], u2['wm'], u2['wbig'], u2['cols'],
      params['fc_big'], params['fc_b_col'])
    # output rows are class-major (row = class*B + batch) -> (B, ncls)
    ncls = ncls_B // B
    return out_col.reshape(ncls, B).T


# ----------------------------- main -------------------------------------------
if __name__ == "__main__":
    B, IC, PATCH, NCLS = 2, 4, 9, 5
    key = jax.random.PRNGKey(0)
    kx, kp = jax.random.split(key)
    x = jax.random.normal(kx, (B, IC, PATCH, PATCH), jnp.float32)
    params = init_params(kp, IC, NCLS, B, PATCH, PATCH)

    _roll_like_jnp()   # calibrate the lane-roll direction once, eagerly
    fwd = jax.jit(lite_hcnet_forward)
    out = jax.block_until_ready(fwd(x, params))
    assert out.shape == (B, NCLS)
    assert bool(jnp.all(jnp.isfinite(out)))
    print("KERNEL_OK")
</pallas_src>

<mosaic_0001>
module attributes {stable_mosaic.version = 11 : i64} {
  func.func @k(%arg0: memref<8x128xf32, #tpu.memory_space<vmem>>, %arg1: memref<8x128xf32, #tpu.memory_space<vmem>>) attributes {dimension_semantics = [], scalar_prefetch = 0 : i64, scratch_operands = 0 : i64, tpu.core_type = #tpu.core_type<tc>} {
    %c0 = arith.constant 0 : index
    %c0_0 = arith.constant 0 : index
    %0 = vector.load %arg0[%c0, %c0_0] : memref<8x128xf32, #tpu.memory_space<vmem>>, vector<8x128xf32>
    %c1_i32 = arith.constant 1 : i32
    %1 = tpu.dynamic_rotate %0 by %c1_i32 dim 1 : vector<8x128xf32>, i32 -> vector<8x128xf32>
    %c0_1 = arith.constant 0 : index
    %c0_2 = arith.constant 0 : index
    %2 = vector.load %arg1[%c0_1, %c0_2] : memref<8x128xf32, #tpu.memory_space<vmem>>, vector<8x128xf32>
    tpu.vector_store %arg1[%c0_1, %c0_2], %1 {strides = array<i32>} : memref<8x128xf32, #tpu.memory_space<vmem>>, vector<8x128xf32>,
    return
  }
}

</mosaic_0001>

<bundles_post_ra>
// kernel: tpu_custom_call.1
= control target key start
LH: loop header
LB: loop body
LE: loop exit
PB: predicated region body
PF: predicated region fallthrough
CT: control target
= control target key end

     0   :  { %6 = vsyncpa [#allocation3], 0  ;;  %s128_s0 = inlined_call_operand.hbm [shape: f32[8,128], index: 0, kind: input, shape index: {}]   ;;  %s129_s1 = inlined_call_operand.hbm [shape: f32[8,128], index: 1, kind: output, shape index: {}]  }
   0x1   :  { %7 = vsyncpa [#allocation4], 0  ;;  %s91_s6 = smov [#allocation2]   ;;  %s43_s10 = scalar_lea.hbm %s128_s0, 128 }
   0x2   :  { %s14_s7 = sshll.u32 %s91_s6, 4  ;;  %p44_p0 = scmp.ne.s32.totalorder %s128_s0, %s43_s10  ;;  %s15_s7 = int_to_ptr.vmem [resolvable:$true] %s14_s7 }
   0x3   :  { %p47_p1 = scmp.lt.u32.totalorder %s43_s10, %s128_s0 }
   0x5   :  { %p49_p2 = pnand %p47_p1, %p44_p0 }
   0x7   :  { %52 = shalt.err (!%p49_p2)
}
   0x8   :  { %s53_s15 = scalar_lea.vmem %s15_s7, 128  ;;  %p58_p4 = scmp.lt.s32.totalorder %s15_s7, %s15_s7 }
   0x9   :  { %p54_p3 = scmp.ne.s32.totalorder %s15_s7, %s53_s15  ;;  %p59_p5 = scmp.lt.s32.totalorder %s53_s15, %s53_s15 }
   0xb   :  { %p60_p6 = por %p59_p5, %p58_p4 }
   0xd   :  { %p61_p7 = pnand %p60_p6, %p54_p3 }
   0xf   :  { %64 = shalt.err (!%p61_p7)
}
  0x10   :  { %17 = dma.hbm_to_vmem [thread:$0]  %s128_s0, 128, %s15_s7, [#allocation3]  }
  0x11   :  { %87 = dma.done.wait [#allocation3], 128  }
  0x12   :  { %88 = vsyncadd [#allocation3], 4294967168  ;;  %v21_v0 = vld [vmem:[#allocation2] sm:$0xff]  ;;  %s92_s18 = smov 1   ;;  %s93_s19 = smov [#allocation5]  }
  0x13   :  { %22 = vrot.lane.b32.xlu0 %v21_v0, %s92_s18  ;;  %s31_s20 = sshll.u32 %s93_s19, 4  ;;  %s32_s20 = int_to_ptr.vmem [resolvable:$true] %s31_s20 }
  0x14   :  { %s65_s21 = scalar_lea.vmem %s32_s20, 128  ;;  %p70_p9 = scmp.lt.s32.totalorder %s32_s20, %s32_s20 }
  0x15   :  { %p66_p8 = scmp.ne.s32.totalorder %s32_s20, %s65_s21  ;;  %p71_p10 = scmp.lt.s32.totalorder %s65_s21, %s65_s21 }
  0x17   :  { %p72_p11 = por %p71_p10, %p70_p9 }
  0x19   :  { %p73_p12 = pnand %p72_p11, %p66_p8 }
  0x85   :  { %v23_v1 = vpop.permute.xlu0 %22 }
  0x86   :  { %24 = vst [vmem:[#allocation5] sm:$0xff] %v23_v1 }
  0x87   :  { %76 = shalt.err (!%p73_p12)
}
  0x88   :  { %s77_s0 = scalar_lea.hbm %s129_s1, 128 }
  0x89   :  { %p78_p13 = scmp.ne.s32.totalorder %s129_s1, %s77_s0  ;;  %p81_p0 = scmp.lt.u32.totalorder %s77_s0, %s129_s1 }
  0x8b   :  { %p83_p1 = pnand %p81_p0, %p78_p13 }
  0x8d   :  { %86 = shalt.err (!%p83_p1)
}
  0x8e   :  { %34 = dma.vmem_to_hbm [thread:$0]  %s32_s20, 128, %s129_s1, [#allocation4]  }
  0x8f   :  { %89 = dma.done.wait [#allocation4], 128  }
  0x90   :  { %90 = vsyncadd [#allocation4], 4294967168 }
  0x91   :  { %38 = vsyncpa [#allocation3], 1 }
  0x92   :  { %39 = vsyncpa [#allocation4], 1 }

</bundles_post_ra>
